<compile_context>
chip_gen: v6e
topology: v6e:2x2x1
jax: 0.10.0
libtpu: 0.0.40
codegen_flags: <defaults>
</compile_context>

<pallas_src>
import math
import functools

import jax
import jax.numpy as jnp
from jax.experimental import pallas as pl
from jax.experimental.pallas import tpu as pltpu


def _round_up(x, m):
    return ((x + m - 1) // m) * m


def router_kernel(x_ref, w_ref, b_ref, o_ref):
    # x_ref: (tm, E_pad)  w_ref: (E_pad, N_pad)  b_ref: (1, N_pad)  o_ref: (tm, N_pad)
    logits = jnp.dot(x_ref[...], w_ref[...], preferred_element_type=jnp.float32)
    # Padded expert lanes carry a -1e30 bias -> exp underflows to 0; no extra mask.
    logits = logits + b_ref[...].astype(jnp.float32)

    m = jnp.max(logits, axis=-1, keepdims=True)
    e = jnp.exp(logits - m)
    denom = jnp.sum(e, axis=-1, keepdims=True)
    o_ref[...] = (e * pl.reciprocal(denom)).astype(o_ref.dtype)


def _resident_spec(shape):
    """BlockSpec for a block whose index is constant across the grid.

    Single-buffered (no point double-buffering a block that never changes);
    falls back to a plain BlockSpec on Pallas versions without pipeline_mode.
    """
    try:
        return pl.BlockSpec(shape, lambda i: (0, 0), pipeline_mode=pl.Buffered(1))
    except TypeError:
        return pl.BlockSpec(shape, lambda i: (0, 0))


def _choose_tile(M, E_pad, N_pad, x_bytes, w_bytes, o_bytes,
                 budget_bytes=32 * 1024 * 1024):
    """Pick a row tile so the VMEM working set fits a conservative budget."""
    resident = E_pad * N_pad * w_bytes + N_pad * w_bytes          # weight + bias (1 buffer)
    per_row = (2 * E_pad * x_bytes            # x tile, double-buffered
               + 2 * N_pad * o_bytes          # out tile, double-buffered
               + 2 * N_pad * 4)               # f32 logits/exp temporaries
    tm = 512
    while tm > 8 and resident + tm * per_row > budget_bytes:
        tm //= 2
    # Guarantee >= 2 grid steps (when possible) so both v7x TensorCores get work.
    half = _round_up(max((M + 1) // 2, 1), 8)
    tm = max(8, min(tm, half))
    working = resident + tm * per_row
    vmem_limit = min(48 << 20, max(32 << 20, int(working) + (8 << 20)))
    return tm, vmem_limit


@jax.jit
def router_forward(x, w, b):
    """x: (..., E); w: (E, N) (transposed vs PyTorch (N, E)); b: (N,).

    Returns softmax(x @ w + b, axis=-1) with shape (..., N).
    """
    *lead, E = x.shape
    N = w.shape[1]
    M = 1
    for d in lead:
        M *= d

    E_pad = _round_up(E, 128)
    N_pad = _round_up(N, 128)

    # Only the lane (E) axis of the activations is padded (elided when E%128==0);
    # the row axis is handled by Pallas' ragged last block.
    x2 = x.reshape(M, E)
    if E_pad != E:
        x2 = jnp.pad(x2, ((0, 0), (0, E_pad - E)))
    w_p = jnp.pad(w, ((0, E_pad - E), (0, N_pad - N)))
    b_p = jnp.pad(b.reshape(1, N), ((0, 0), (0, N_pad - N)),
                  constant_values=-1e30)

    tm, vmem_limit = _choose_tile(
        M, E_pad, N_pad,
        x2.dtype.itemsize, w_p.dtype.itemsize, x.dtype.itemsize)

    flops = 2 * M * E_pad * N_pad + 5 * M * N_pad
    bytes_accessed = (x2.size * x2.dtype.itemsize
                      + w_p.size * w_p.dtype.itemsize
                      + b_p.size * b_p.dtype.itemsize
                      + M * N_pad * x.dtype.itemsize)

    out = pl.pallas_call(
        router_kernel,
        out_shape=jax.ShapeDtypeStruct((M, N_pad), x.dtype),
        grid_spec=pltpu.PrefetchScalarGridSpec(
            num_scalar_prefetch=0,
            grid=(pl.cdiv(M, tm),),
            in_specs=[
                pl.BlockSpec((tm, E_pad), lambda i: (i, 0)),   # activations (streamed rows)
                _resident_spec((E_pad, N_pad)),                # gate weight (VMEM-resident)
                _resident_spec((1, N_pad)),                    # gate bias   (VMEM-resident)
            ],
            out_specs=pl.BlockSpec((tm, N_pad), lambda i: (i, 0)),
        ),
        compiler_params=pltpu.CompilerParams(
            dimension_semantics=("parallel",),
            vmem_limit_bytes=vmem_limit),
        cost_estimate=pl.CostEstimate(
            flops=flops,
            transcendentals=M * N_pad,
            bytes_accessed=bytes_accessed),
    )(x2, w_p, b_p)

    out = out[:, :N]
    return out.reshape(*lead, N)


def init_params(key, embed_dim, num_experts):
    """Mimics nn.Linear default init (uniform +-1/sqrt(fan_in)); weight stored (in, out)."""
    kw, kb = jax.random.split(key)
    bound = 1.0 / math.sqrt(embed_dim)
    w = jax.random.uniform(kw, (embed_dim, num_experts), jnp.float32, -bound, bound)
    b = jax.random.uniform(kb, (num_experts,), jnp.float32, -bound, bound)
    return w, b


def reference(x, w, b):
    return jax.nn.softmax(x @ w + b, axis=-1)


if __name__ == "__main__":
    B, S, E, N_EXP = 2, 8, 32, 8
    key = jax.random.PRNGKey(0)
    kx, kp = jax.random.split(key)
    x = jax.random.normal(kx, (B, S, E), jnp.float32)
    w, b = init_params(kp, E, N_EXP)

    out = jax.block_until_ready(router_forward(x, w, b))

    ref = reference(x, w, b)
    assert out.shape == (B, S, N_EXP)
    assert jnp.allclose(out, ref, atol=1e-5, rtol=1e-5), "mismatch vs reference"
    assert jnp.allclose(out.sum(-1), 1.0, atol=1e-5), "softmax rows must sum to 1"
    print("KERNEL_OK")
</pallas_src>

<mosaic_0001>
module attributes {stable_mosaic.version = 11 : i64} {
  func.func @router_kernel(%arg0: i32, %arg1: memref<8x128xf32, #tpu.memory_space<vmem>>, %arg2: memref<128x128xf32, #tpu.memory_space<vmem>>, %arg3: memref<1x128xf32, #tpu.memory_space<vmem>>, %arg4: memref<8x128xf32, #tpu.memory_space<vmem>>) attributes {dimension_semantics = [#tpu.dimension_semantics<parallel>], iteration_bounds = array<i64: 2>, scalar_prefetch = 0 : i64, scratch_operands = 0 : i64, tpu.core_type = #tpu.core_type<tc>, window_params = [{transform_indices = @transform_0, window_bounds = array<i64: 8, 128>}, {pipeline_mode = #tpu.pipeline_mode<synchronous>, transform_indices = @transform_1, window_bounds = array<i64: 128, 128>}, {pipeline_mode = #tpu.pipeline_mode<synchronous>, transform_indices = @transform_2, window_bounds = array<i64: 1, 128>}, {transform_indices = @transform_3, window_bounds = array<i64: 8, 128>}]} {
    %c0 = arith.constant 0 : index
    %c0_0 = arith.constant 0 : index
    %0 = vector.load %arg1[%c0, %c0_0] : memref<8x128xf32, #tpu.memory_space<vmem>>, vector<8x128xf32>
    %c0_1 = arith.constant 0 : index
    %c0_2 = arith.constant 0 : index
    %1 = vector.load %arg2[%c0_1, %c0_2] : memref<128x128xf32, #tpu.memory_space<vmem>>, vector<128x128xf32>
    %cst = arith.constant dense<0.000000e+00> : vector<8x128xf32>
    %2 = tpu.matmul %0, %1, %cst {dimension_numbers = #tpu.dot_dimension_numbers<[1], [0], [0], [1], [0, 0, 1, 1], [], []>} : vector<8x128xf32>, vector<128x128xf32>, vector<8x128xf32> -> vector<8x128xf32>
    %c0_3 = arith.constant 0 : index
    %c0_4 = arith.constant 0 : index
    %3 = vector.load %arg3[%c0_3, %c0_4] : memref<1x128xf32, #tpu.memory_space<vmem>>, vector<1x128xf32>
    %4 = vector.broadcast %3 : vector<1x128xf32> to vector<8x128xf32>
    %5 = arith.addf %2, %4 : vector<8x128xf32>
    %cst_5 = arith.constant dense<0xFF800000> : vector<8xf32>
    %6 = vector.multi_reduction <maximumf>, %5, %cst_5 [1] : vector<8x128xf32> to vector<8xf32>
    %7 = vector.shape_cast %6 : vector<8xf32> to vector<8x1xf32>
    %8 = vector.broadcast %7 : vector<8x1xf32> to vector<8x128xf32>
    %9 = arith.subf %5, %8 : vector<8x128xf32>
    %10 = math.exp %9 : vector<8x128xf32>
    %cst_6 = arith.constant dense<0.000000e+00> : vector<8xf32>
    %11 = vector.multi_reduction <add>, %10, %cst_6 [1] : vector<8x128xf32> to vector<8xf32>
    %12 = vector.shape_cast %11 : vector<8xf32> to vector<8x1xf32>
    %13 = tpu.reciprocal %12 : vector<8x1xf32> -> vector<8x1xf32>
    %14 = vector.broadcast %13 : vector<8x1xf32> to vector<8x128xf32>
    %15 = arith.mulf %10, %14 : vector<8x128xf32>
    %c0_7 = arith.constant 0 : index
    %c0_8 = arith.constant 0 : index
    %16 = vector.load %arg4[%c0_7, %c0_8] : memref<8x128xf32, #tpu.memory_space<vmem>>, vector<8x128xf32>
    tpu.vector_store %arg4[%c0_7, %c0_8], %15 {strides = array<i32>} : memref<8x128xf32, #tpu.memory_space<vmem>>, vector<8x128xf32>,
    return
  }
  func.func @transform_0(%arg0: i32) -> (i32, i32) {
    %c0_i32 = arith.constant 0 : i32
    %c0_i32_0 = arith.constant 0 : i32
    return %arg0, %c0_i32 : i32, i32
  }
  func.func @transform_1(%arg0: i32) -> (i32, i32) {
    %c0_i32 = arith.constant 0 : i32
    %c0_i32_0 = arith.constant 0 : i32
    %c0_i32_1 = arith.constant 0 : i32
    return %c0_i32, %c0_i32_0 : i32, i32
  }
  func.func @transform_2(%arg0: i32) -> (i32, i32) {
    %c0_i32 = arith.constant 0 : i32
    %c0_i32_0 = arith.constant 0 : i32
    %c0_i32_1 = arith.constant 0 : i32
    return %c0_i32, %c0_i32_0 : i32, i32
  }
  func.func @transform_3(%arg0: i32) -> (i32, i32) {
    %c0_i32 = arith.constant 0 : i32
    %c0_i32_0 = arith.constant 0 : i32
    return %arg0, %c0_i32 : i32, i32
  }
}

</mosaic_0001>

<bundles_post_ra>
// kernel: router_forward.1
= control target key start
LH: loop header
LB: loop body
LE: loop exit
PB: predicated region body
PF: predicated region fallthrough
CT: control target
= control target key end

     0   :  { %s429_s12 = smov 0   ;;  %s508_s0 = inlined_call_operand.vmem [shape: f32[16,128], index: 0, kind: input, shape index: {}]   ;;  %s509_s1 = inlined_call_operand.vmem [shape: f32[128,128], index: 1, kind: input, shape index: {}]   ;;  %s510_s2 = inlined_call_operand.vmem [shape: f32[1,128], index: 2, kind: input, shape index: {}]   ;;  %s511_s3 = inlined_call_operand.vmem [shape: f32[16,128], index: 3, kind: output, shape index: {}]  }
   0x1 LB: > { %s323_s13 = sadd.s32 4294967295, %s405_s12   ;;  %p327_p0 = scmp.ge.s32.totalorder %s405_s12, 1  ;;  %s405_s12 = sphi %s429_s12, %s13_s12  }
   0x2   : > { %p136_p1 = scmp.lt.s32.totalorder %s405_s12, 3 }
   0x4   : > { %p137_p2 = pnand %p327_p0, %p136_p1 }
   0x5   : > { %p158_p3 = scmp.lt.s32.totalorder (!%p137_p2), %s323_s13, 1 }
   0x6   : > { %140 = sbr.rel (%p137_p2) target bundleno = 550 (0x226), region = 32 }
   0xb   : > { %v182_v0 = vld [vmem:[%s509_s1 + $0x78] sm:$0xff]  ;;  %v407_v1 = vmov 0.0   ;;  %v181_v2 = vld [vmem:[%s509_s1 + $0x70] sm:$0xff]  ;;  %vm408_vm0 = vmmov 0   ;;  %v180_v3 = vld [vmem:[%s509_s1 + $0x68] sm:$0xff]  ;;  %s513_s13 = smov (!%p158_p3, %s323_s13), 1 }
   0xc   : > { %350 = vmatprep.subr.mxu0 %v407_v1  ;;  %382 = vmatprep.mubr.msk.f32.mxu0 %vm408_vm0, %v407_v1  ;;  %v179_v4 = vld [vmem:[%s509_s1 + $0x60] sm:$0xff]  ;;  %v178_v5 = vld [vmem:[%s509_s1 + $0x58] sm:$0xff]  ;;  %v177_v6 = vld [vmem:[%s509_s1 + $0x50] sm:$0xff]  ;;  %s328_s15 = sshll.u32 %s513_s13, 3 }
   0xd   : > { %351 = vmatpush3.msra.mxu0 %v182_v0  ;;  %v176_v7 = vld [vmem:[%s509_s1 + $0x48] sm:$0xff]  ;;  %v175_v8 = vld [vmem:[%s509_s1 + $0x40] sm:$0xff]  ;;  %v174_v9 = vld [vmem:[%s509_s1 + $0x38] sm:$0xff]  ;;  %s161_s22 = scalar_lea.vmem %s508_s0, %s328_s15  ;;  %s165_s29 = scalar_lea.vmem %s511_s3, %s328_s15 }
   0xe   : > { %352 = vmatprep.subr.mxu0 %v407_v1  ;;  %v173_v10 = vld [vmem:[%s509_s1 + $0x30] sm:$0xff]  ;;  %v172_v11 = vld [vmem:[%s509_s1 + $0x28] sm:$0xff]  ;;  %v171_v12 = vld [vmem:[%s509_s1 + $0x20] sm:$0xff] }
   0xf   : > { %353 = vmatpush3.msra.mxu0 %v181_v2  ;;  %v170_v13 = vld [vmem:[%s509_s1 + $0x18] sm:$0xff]  ;;  %v169_v14 = vld [vmem:[%s509_s1 + $0x10] sm:$0xff]  ;;  %v168_v15 = vld [vmem:[%s509_s1 + $0x8] sm:$0xff] }
  0x10   : > { %354 = vmatprep.subr.mxu0 %v407_v1  ;;  %v167_v16 = vld [vmem:[%s509_s1] sm:$0xff] }
  0x11   : > { %355 = vmatpush3.msra.mxu0 %v180_v3  ;;  %v166_v17 = vld [vmem:[%s161_s22] sm:$0xff] }
  0x12   : > { %356 = vmatprep.subr.mxu0 %v407_v1  ;;  %v330_v18 = vld [vmem:[%s510_s2] ss:$0 sm:$0xff] }
  0x13   : > { %357 = vmatpush3.msra.mxu0 %v179_v4 }
  0x14   : > { %358 = vmatprep.subr.mxu0 %v407_v1 }
  0x15   : > { %359 = vmatpush3.msra.mxu0 %v178_v5 }
  0x16   : > { %360 = vmatprep.subr.mxu0 %v407_v1 }
  0x17   : > { %361 = vmatpush3.msra.mxu0 %v177_v6 }
  0x18   : > { %362 = vmatprep.subr.mxu0 %v407_v1 }
  0x19   : > { %363 = vmatpush3.msra.mxu0 %v176_v7 }
  0x1a   : > { %364 = vmatprep.subr.mxu0 %v407_v1 }
  0x1b   : > { %365 = vmatpush3.msra.mxu0 %v175_v8 }
  0x1c   : > { %366 = vmatprep.subr.mxu0 %v407_v1 }
  0x1d   : > { %367 = vmatpush3.msra.mxu0 %v174_v9 }
  0x1e   : > { %368 = vmatprep.subr.mxu0 %v407_v1 }
  0x1f   : > { %369 = vmatpush3.msra.mxu0 %v173_v10 }
  0x20   : > { %370 = vmatprep.subr.mxu0 %v407_v1 }
  0x21   : > { %371 = vmatpush3.msra.mxu0 %v172_v11 }
  0x22   : > { %372 = vmatprep.subr.mxu0 %v407_v1 }
  0x23   : > { %373 = vmatpush3.msra.mxu0 %v171_v12 }
  0x24   : > { %374 = vmatprep.subr.mxu0 %v407_v1 }
  0x25   : > { %375 = vmatpush3.msra.mxu0 %v170_v13 }
  0x26   : > { %376 = vmatprep.subr.mxu0 %v407_v1 }
  0x27   : > { %377 = vmatpush3.msra.mxu0 %v169_v14 }
  0x28   : > { %378 = vmatprep.subr.mxu0 %v407_v1 }
  0x29   : > { %379 = vmatpush3.msra.mxu0 %v168_v15 }
  0x2a   : > { %380 = vmatprep.subr.mxu0 %v407_v1 }
  0x2b   : > { %381 = vmatpush3.msra.mxu0 %v167_v16 }
  0x2c   : > { %383 = vmatmul.mubr.f32.vlgmr.msra.gmra.mxu0 %v166_v17 }
  0xec   : > { %v256_v19 = vpop.f32.mrf.mxu0 }
  0xed   : > { %v257_v20 = vadd.f32 %v330_v18, %v256_v19 }
  0xee   : > { %v384_v21 = vpop.f32.mrf.mxu0 }
  0xef   : > { %260 = vmax.xlane.f32.xlu0 %v257_v20 }
 0x178   : > { %v261_v22 = vpop.xlane.xlu0 %260 }
 0x179   : > { %v262_v23 = vsub.f32 %v257_v20, %v261_v22 }
 0x17b   : > { %v263_v24 = vmul.f32 1.442695, %v262_v23 }
 0x17d   : > { %395 = vpow2.f32 %v263_v24 }
 0x18a   : > { %v396_v25 = vpop.eup %395 }
 0x18b   : > { %265 = vadd.xlane.f32.xlu0 %v396_v25 }
 0x214   : > { %v266_v26 = vpop.xlane.xlu0 %265 }
 0x215   : > { %397 = vrcp.f32 %v266_v26 }
 0x222   : > { %v398_v27 = vpop.eup %397 }
 0x223   : > { %v268_v28 = vmul.f32 %v398_v27, %v396_v25 }
 0x225   : > { %269 = vst [vmem:[%s165_s29] sm:$0xff] %v268_v28 }
 0x226 PF: > { %s13_s12 = sadd.s32 1, %s405_s12  }
 0x227   : > { %p10_p4 = scmp.ge.s32.totalorder %s13_s12, 4  }
 0x229   :  { %12 = sbr.rel (!%p10_p4) target bundleno = 1 (0x1), region = 62 }

</bundles_post_ra>
